<compile_context>
chip_gen: v6e
topology: v6e:2x2x1
jax: 0.10.0
libtpu: 0.0.40
codegen_flags: <defaults>
</compile_context>

<pallas_src>
import functools

import jax
import jax.numpy as jnp
import numpy as np
from jax.experimental import pallas as pl
from jax.experimental.pallas import tpu as pltpu


def _round_up(a: int, m: int) -> int:
    return (a + m - 1) // m * m


def _hw_vmem_budget_bytes() -> int:
    """Half of physical VMEM (per core), conservative fallback if query fails."""
    try:
        cap = int(pltpu.get_tpu_info().vmem_capacity_bytes)
    except Exception:
        cap = 64 << 20                       # conservative: v7x per-TC physical VMEM
    return max(16 << 20, min(cap // 2, 96 << 20))


@functools.lru_cache(maxsize=4)
def _dft_basis(N: int, half_len: int, N_pad: int, K_pad: int, dtype):
    """Fused [cos | -sin] DFT basis, zero-padded to (N_pad, 2*K_pad).

    NOTE: each cached entry is a device-resident O(N_pad * 2*K_pad) array; the
    small maxsize keeps many distinct sequence lengths from pinning GBs of HBM.
    """
    n = np.arange(N, dtype=np.float64)[:, None]
    k = np.arange(half_len, dtype=np.float64)[None, :]
    ang = 2.0 * np.pi * n * k / N
    basis = np.zeros((N_pad, 2 * K_pad), dtype=np.float32)
    basis[:N, :half_len] = np.cos(ang)
    basis[:N, K_pad:K_pad + half_len] = -np.sin(ang)
    return jnp.asarray(basis, dtype=dtype)


def _choose_streamed_tiles(N_pad, K2, TB, itemsize, budget):
    """Pick (TK, TN, n_buf) for the streamed path: large TK first (fewer x
    re-reads / grid steps), then large TN (pipeline efficiency), under budget."""
    limit = int(0.8 * budget)
    tk_cands = list(dict.fromkeys(c for c in (K2, 4096, 2048, 1024, 512, 256)
                                  if c <= K2 and K2 % c == 0))
    tn_cands = [c for c in (1024, 512, 256, 128) if c <= N_pad and N_pad % c == 0]
    for TK in tk_cands:
        for TN in tn_cands:
            n_buf = 3 if (N_pad // TN) >= 3 else 2
            ws = (2 * TB * TN * 4            # x blocks (f32 in VMEM), double-buffered
                  + n_buf * TN * TK * itemsize  # basis blocks
                  + 2 * TB * TK * 4          # out blocks (f32)
                  + TB * TK * 4)             # f32 accumulator
            if ws <= limit:
                return TK, TN, n_buf
    return 256, 128, (3 if (N_pad // 128) >= 3 else 2)


# --------------------------------- kernels -----------------------------------

def _dft_resident_kernel(x_ref, basis_ref, out_ref, *, cast_dtype):
    # x: (TB, N_pad)   basis: (N_pad, TK) -- VMEM-resident   out: (TB, TK) f32
    x = x_ref[...]
    if cast_dtype is not None:
        x = x.astype(cast_dtype)
    out_ref[...] = jnp.dot(x, basis_ref[...], preferred_element_type=jnp.float32)


def _dft_streamed_kernel(x_ref, basis_ref, out_ref, acc_ref, *, cast_dtype):
    # x: (TB, TN)   basis: (TN, TK)   out/acc: (TB, TK) f32; reduction over axis 2
    @pl.when(pl.program_id(2) == 0)
    def _():
        acc_ref[...] = jnp.zeros_like(acc_ref)

    x = x_ref[...]
    if cast_dtype is not None:
        x = x.astype(cast_dtype)
    acc_ref[...] += jnp.dot(x, basis_ref[...], preferred_element_type=jnp.float32)

    @pl.when(pl.program_id(2) == pl.num_programs(2) - 1)
    def _():
        out_ref[...] = acc_ref[...]


# --------------------------------- wrapper -----------------------------------

def half_fft(x, *, use_bf16_basis: bool = False, vmem_budget_bytes=None):
    """complex64 (B, round(N/2)) == torch.fft.fft(x)[:, :round(N/2)] for real x."""
    if x.ndim != 2:
        raise ValueError("half_fft expects a 2-D (batch, seq) input")
    if jnp.issubdtype(x.dtype, jnp.complexfloating):
        # TODO(synk): complex input needs a second matmul on imag(x); real-only here.
        raise NotImplementedError("half_fft: real-valued input only")

    B, N = x.shape
    half_len = round(N / 2)                    # matches the PyTorch reference

    cast_dtype = jnp.bfloat16 if use_bf16_basis else None
    basis_dtype = jnp.bfloat16 if use_bf16_basis else jnp.float32
    itemsize = 2 if use_bf16_basis else 4

    # --- padding / batch tiling ---------------------------------------------
    K_pad = _round_up(max(half_len, 1), 128)   # lane-dense half-width
    K2 = 2 * K_pad                             # fused re|im output width
    N_pad = _round_up(N, 128)

    # 256 rows feeds the 2x256^2 MXUs on v6e/v7x; small B stays in one tile.
    sub = 16 if use_bf16_basis else 8
    TB = _round_up(max(B, 1), sub) if B <= 256 else 256
    B_pad = _round_up(B, TB)
    B_tiles = B_pad // TB

    hw_budget = _hw_vmem_budget_bytes()
    budget = hw_budget if vmem_budget_bytes is None else min(hw_budget, int(vmem_budget_bytes))

    basis = _dft_basis(N, half_len, N_pad, K_pad, basis_dtype)

    x_f32 = x.astype(jnp.float32)              # keep f32 in HBM; cast per-tile for bf16
    if B_pad != B or N_pad != N:
        x_f32 = jnp.pad(x_f32, ((0, B_pad - B), (0, N_pad - N)))

    # Working set if the whole basis sits in VMEM (double-buffered worst case).
    ws_resident = 2 * N_pad * K2 * itemsize + 2 * TB * N_pad * 4 + 2 * TB * K2 * 4

    if ws_resident <= int(0.8 * budget):
        # ------------------------- RESIDENT-BASIS PATH -------------------------
        # Split K into two parallel tiles only when the B axis has no parallelism,
        # so both v7x TensorCores get work; otherwise one full-width slab.
        TK = K2 // 2 if (B_tiles == 1 and K2 >= 256) else K2
        grid = (B_tiles, K2 // TK)

        cost = pl.CostEstimate(
            flops=2 * B_pad * N_pad * K2,
            transcendentals=0,
            bytes_accessed=B_pad * N_pad * 4 + N_pad * K2 * itemsize + B_pad * K2 * 4,
        )

        out_pad = pl.pallas_call(
            functools.partial(_dft_resident_kernel, cast_dtype=cast_dtype),
            out_shape=jax.ShapeDtypeStruct((B_pad, K2), jnp.float32),
            grid_spec=pltpu.PrefetchScalarGridSpec(
                num_scalar_prefetch=0,
                grid=grid,
                in_specs=[
                    # x block index depends only on i -> fetched once per B-tile.
                    pl.BlockSpec((TB, N_pad), lambda i, j: (i, 0)),
                    # basis block index is constant (or once per K-half) -> fetched once.
                    pl.BlockSpec((N_pad, TK), lambda i, j: (0, j)),
                ],
                out_specs=pl.BlockSpec((TB, TK), lambda i, j: (i, j)),
            ),
            compiler_params=pltpu.CompilerParams(
                dimension_semantics=("parallel", "parallel"),
                vmem_limit_bytes=int(hw_budget)),
            cost_estimate=cost,
        )(x_f32, basis)
    else:
        # --------------------------- STREAMED PATH -----------------------------
        TK, TN, n_buf = _choose_streamed_tiles(N_pad, K2, TB, itemsize, budget)
        grid = (B_tiles, K2 // TK, N_pad // TN)
        n_steps = grid[2]

        basis_kwargs = {}
        if n_steps >= 3 and n_buf >= 3:
            basis_kwargs["pipeline_mode"] = pl.Buffered(3)

        cost = pl.CostEstimate(
            flops=2 * B_pad * N_pad * K2,
            transcendentals=0,
            bytes_accessed=(B_pad * N_pad * 4 * (K2 // TK)
                            + N_pad * K2 * itemsize * B_tiles
                            + B_pad * K2 * 4),
        )

        out_pad = pl.pallas_call(
            functools.partial(_dft_streamed_kernel, cast_dtype=cast_dtype),
            out_shape=jax.ShapeDtypeStruct((B_pad, K2), jnp.float32),
            grid_spec=pltpu.PrefetchScalarGridSpec(
                num_scalar_prefetch=0,
                grid=grid,
                in_specs=[
                    pl.BlockSpec((TB, TN), lambda i, j, k: (i, k)),
                    pl.BlockSpec((TN, TK), lambda i, j, k: (k, j), **basis_kwargs),
                ],
                out_specs=pl.BlockSpec((TB, TK), lambda i, j, k: (i, j)),
                scratch_shapes=[pltpu.VMEM((TB, TK), jnp.float32)],
            ),
            compiler_params=pltpu.CompilerParams(
                dimension_semantics=("parallel", "parallel", "arbitrary"),
                vmem_limit_bytes=int(hw_budget)),
            cost_estimate=cost,
        )(x_f32, basis)

    re = out_pad[:B, :half_len]
    im = out_pad[:B, K_pad:K_pad + half_len]
    return jax.lax.complex(re, im)


if __name__ == "__main__":
    key = jax.random.PRNGKey(0)

    # Small shape consistent with the module (2-D: batch, seq) -> resident path.
    B, N = 4, 16
    x = jax.random.normal(key, (B, N), dtype=jnp.float32)
    out = jax.block_until_ready(half_fft(x))
    ref = jnp.fft.fft(x)[:, : round(N / 2)].astype(jnp.complex64)
    np.testing.assert_allclose(np.asarray(out), np.asarray(ref),
                               rtol=1e-4, atol=1e-4)

    # Larger shape: resident basis with a 2-way K split (megacore-friendly on v7x).
    B2, N2 = 4, 1024
    x2 = jax.random.normal(jax.random.PRNGKey(1), (B2, N2), dtype=jnp.float32)
    out2 = jax.block_until_ready(half_fft(x2))
    ref2 = jnp.fft.fft(x2)[:, : round(N2 / 2)].astype(jnp.complex64)
    np.testing.assert_allclose(np.asarray(out2), np.asarray(ref2),
                               rtol=5e-3, atol=5e-3)

    # Force the streamed (large-N) path with a tiny decision budget to exercise
    # the tiled K / N-reduction grid and the f32 accumulator.
    out3 = jax.block_until_ready(half_fft(x2, vmem_budget_bytes=2 << 20))
    np.testing.assert_allclose(np.asarray(out3), np.asarray(ref2),
                               rtol=5e-3, atol=5e-3)

    print("KERNEL_OK")
</pallas_src>

<mosaic_0001>
module attributes {stable_mosaic.version = 11 : i64} {
  func.func @_dft_resident_kernel(%arg0: i32, %arg1: i32, %arg2: memref<8x128xf32, #tpu.memory_space<vmem>>, %arg3: memref<128x128xf32, #tpu.memory_space<vmem>>, %arg4: memref<8x128xf32, #tpu.memory_space<vmem>>) attributes {dimension_semantics = [#tpu.dimension_semantics<parallel>, #tpu.dimension_semantics<parallel>], iteration_bounds = array<i64: 1, 2>, scalar_prefetch = 0 : i64, scratch_operands = 0 : i64, tpu.core_type = #tpu.core_type<tc>, window_params = [{transform_indices = @transform_0, window_bounds = array<i64: 8, 128>}, {transform_indices = @transform_1, window_bounds = array<i64: 128, 128>}, {transform_indices = @transform_2, window_bounds = array<i64: 8, 128>}]} {
    %c0 = arith.constant 0 : index
    %c0_0 = arith.constant 0 : index
    %0 = vector.load %arg2[%c0, %c0_0] : memref<8x128xf32, #tpu.memory_space<vmem>>, vector<8x128xf32>
    %c0_1 = arith.constant 0 : index
    %c0_2 = arith.constant 0 : index
    %1 = vector.load %arg3[%c0_1, %c0_2] : memref<128x128xf32, #tpu.memory_space<vmem>>, vector<128x128xf32>
    %cst = arith.constant dense<0.000000e+00> : vector<8x128xf32>
    %2 = tpu.matmul %0, %1, %cst {dimension_numbers = #tpu.dot_dimension_numbers<[1], [0], [0], [1], [0, 0, 1, 1], [], []>} : vector<8x128xf32>, vector<128x128xf32>, vector<8x128xf32> -> vector<8x128xf32>
    %c0_3 = arith.constant 0 : index
    %c0_4 = arith.constant 0 : index
    %3 = vector.load %arg4[%c0_3, %c0_4] : memref<8x128xf32, #tpu.memory_space<vmem>>, vector<8x128xf32>
    tpu.vector_store %arg4[%c0_3, %c0_4], %2 {strides = array<i32>} : memref<8x128xf32, #tpu.memory_space<vmem>>, vector<8x128xf32>,
    return
  }
  func.func @transform_0(%arg0: i32, %arg1: i32) -> (i32, i32) {
    %c0_i32 = arith.constant 0 : i32
    %c0_i32_0 = arith.constant 0 : i32
    return %arg0, %c0_i32 : i32, i32
  }
  func.func @transform_1(%arg0: i32, %arg1: i32) -> (i32, i32) {
    %c0_i32 = arith.constant 0 : i32
    %c0_i32_0 = arith.constant 0 : i32
    return %c0_i32, %arg1 : i32, i32
  }
  func.func @transform_2(%arg0: i32, %arg1: i32) -> (i32, i32) {
    %c0_i32 = arith.constant 0 : i32
    return %arg0, %arg1 : i32, i32
  }
}

</mosaic_0001>

<bundles_post_ra>
// kernel: tpu_custom_call.1
= control target key start
LH: loop header
LB: loop body
LE: loop exit
PB: predicated region body
PF: predicated region fallthrough
CT: control target
= control target key end

     0   :  { %7 = vsyncpa [#allocation3], 0  ;;  %s895_s0 = inlined_call_operand.hbm [shape: f32[8,128], index: 0, kind: input, shape index: {}]   ;;  %s896_s1 = inlined_call_operand.hbm [shape: f32[128,256], index: 1, kind: input, shape index: {}]   ;;  %s897_s2 = inlined_call_operand.hbm [shape: f32[8,256], index: 2, kind: output, shape index: {}]  }
   0x1   :  { %8 = vsyncpa [#allocation6], 0 }
   0x2   :  { %10 = vsyncpa [#allocation6 + $0x1], 0 }
   0x3   :  { %11 = vsyncpa [#allocation4], 0 }
   0x4   :  { %13 = vsyncpa [#allocation4 + $0x1], 0  ;;  %s701_s9 = smov 0   ;;  %s703_s10 = smov 0  }
   0x5   :  { %s705_s11 = smov 0   ;;  %s707_s12 = smov 0  }
   0x6   :  { %s709_s13 = smov 0   ;;  %s711_s14 = smov 0  }
   0x7 LB: > { %s393_s15 = sadd.s32 4294967295, %s676_s14   ;;  %s394_s16 = sadd.s32 4294967294, %s676_s14   ;;  %s676_s14 = sphi %s711_s14, %s19_s14   ;;  %s672_s13 = sphi %s709_s13, %s916_s13   ;;  %s668_s12 = sphi %s707_s12, %s915_s12   ;;  %s664_s11 = sphi %s705_s11, %s914_s11   ;;  %s660_s10 = sphi %s703_s10, %s913_s10   ;;  %s656_s9 = sphi %s701_s9, %s912_s9  }
   0x8   : > { %s64_s17 = sadd.s32 1, %s664_s11  ;;  %p71_p0 = scmp.ne.s32.totalorder %s664_s11, %s660_s10 }
   0x9   : > { %p72_p1 = scmp.eq.s32.totalorder %s676_s14, 0  ;;  %p77_p2 = scmp.ne.s32.totalorder %s660_s10, %s656_s9 }
   0xa   : > { %p739_p3 = scmp.eq.s32.totalorder %s393_s15, 0  ;;  %p103_p4 = scmp.eq.s32.totalorder %s393_s15, 1 }
   0xb   : > { %p743_p5 = por %p72_p1, %p71_p0  ;;  %p109_p6 = scmp.eq.s32.totalorder %s394_s16, 1 }
   0xc   : > { %p749_p7 = por %p739_p3, %p77_p2  ;;  %p753_p8 = por %p103_p4, %p71_p0 }
   0xd   : > { %p757_p9 = por %p109_p6, %p77_p2  ;;  %p395_p10 = scmp.ge.s32.totalorder %s676_s14, 1 }
   0xe   : > { %s902_s20 = scalar_select %p749_p7, 1, 0 }
   0xf   : > { %s903_s21 = scalar_select %p753_p8, 1, 0 }
  0x10   : > { %s904_s22 = scalar_select %p757_p9, 1, 0 }
  0x11   : > { %p116_p11 = scmp.lt.s32.totalorder %s676_s14, 3  ;;  %s678_s24 = smov [#allocation2]  }
  0x12   : > { %s131_s25 = sshll.u32 %s678_s24, 4  ;;  %p481_p1 = scmp.lt.s32.totalorder %s676_s14, 2  ;;  %s132_s25 = int_to_ptr.vmem [resolvable:$true] %s131_s25 }
  0x13   : > { %p764_p13 = pnand %p395_p10, %p116_p11  ;;  %s28_s28 = sadd.s32 1, %s672_s13 }
  0x14   : > { %p773_p4 = pnand %p481_p1, %p743_p5  ;;  %p29_p6 = scmp.ge.s32.totalorder %s28_s28, 2 }
  0x15   : > { %p468_p0 = pneg %p764_p13  ;;  %s142_s29 = sand.u32 1, %s664_s11  }
  0x16   : > { %s549_s30 = scalar_lea.vmem %s132_s25, 128  ;;  %p557_p8 = scmp.lt.s32.totalorder %s132_s25, %s132_s25 }
  0x17   : > { %p779_p2 = pnand %p468_p0, %p739_p3  ;;  %p550_p11 = scmp.ne.s32.totalorder %s132_s25, %s549_s30 }
  0x18   : > { %p558_p5 = scmp.lt.s32.totalorder %s549_s30, %s549_s30 }
  0x19   : > { %p540_p10 = pneg %p779_p2 }
  0x1a   : > { %p559_p1 = por %p558_p5, %p557_p8 }
  0x1b   : > { %p552_p12 = pnand %p550_p11, %p540_p10 }
  0x1d   : > { %p553_p9 = pneg %p552_p12 }
  0x1f   : > { %p560_p7 = pnand %p559_p1, %p553_p9 }
  0x21   : > { %563 = shalt.err (!%p560_p7)
}
  0x22   : > { %471 = dma.hbm_to_vmem [thread:$0]  (!%p779_p2), %s895_s0, 128, %s132_s25, [#allocation3]  }
  0x23   : > { %s918_s28 = smov (%p29_p6, %s28_s28), 0  ;;  %s398_s5 = sshll.u32 %s142_s29, 7 }
  0x24   : > { %s61_s6 = ssub.s32 %s672_s13, %s918_s28  ;;  %s399_s7 = sshll.u32 %s672_s13, 7 }
  0x25   : > { %p62_p12 = scmp.eq.s32.totalorder %s61_s6, 0  ;;  %s151_s16 = scalar_lea.hbm %s896_s1, %s399_s7 }
  0x26   : > { %s146_s19 = scalar_lea.vmem [#allocation5], %s398_s5  ;;  %s143_s30 = scalar_lea.sflag [#allocation6], %s142_s29 }
  0x27   : > { %s152_s24 = sshll.u32 %s146_s19, 4  ;;  %p566_p7 = pneg %p773_p4  ;;  %s153_s24 = int_to_ptr.vmem [resolvable:$true] %s152_s24 }
  0x28   : > { %s803_s27 = scalar_select %p62_p12, %s664_s11, %s64_s17  }
  0x29   : > { %s577_s25 = scalar_lea.vmem %s153_s24, 2048  ;;  %s679_s3 = smov [#allocation5]  }
  0x2a   : > { %p578_p8 = scmp.ne.s32.totalorder %s153_s24, %s577_s25  ;;  %s582_s4 = sshll.u32 %s679_s3, 4  ;;  %s583_s4 = int_to_ptr.vmem [resolvable:$false] %s582_s4 }
  0x2b   : > { %s584_s6 = scalar_lea.vmem %s583_s4, 4096  ;;  %p585_p2 = scmp.lt.s32.totalorder %s153_s24, %s583_s4 }
  0x2c   : > { %p580_p9 = pnand %p578_p8, %p566_p7  ;;  %p586_p6 = scmp.lt.s32.totalorder %s584_s6, %s577_s25 }
  0x2e   : > { %p581_p0 = pneg %p580_p9  ;;  %p587_p10 = por %p586_p6, %p585_p2 }
  0x30   : > { %p588_p11 = pnand %p587_p10, %p581_p0 }
  0x32   : > { %591 = shalt.err (!%p588_p11)
}
  0x33   : > { %s680_s5 = smov 256   ;;  %s681_s17 = smov 128  }
  0x34   : > { %s682_s7 = smov 8   ;;  %164 = sbr.rel (%p764_p13) target bundleno = 302 (0x12e), region = 28 }
  0x35   : > { %475 = dma.hbm_to_vmem [thread:$0]  (!%p773_p4), %s151_s16, 2048, %s153_s24, %s143_s30, %s680_s5, %s681_s17, %s682_s7  }
  0x39   : > { %643 = dma.done.wait (%p739_p3), [#allocation3], 128  }
  0x3a   : > { %645 = vsyncadd (%p739_p3), [#allocation3], 4294967168  ;;  %s816_s29 = sand.u32 1, %s660_s10   ;;  %p908_p4 = scmp.ne.s32.totalorder %s902_s20, 0 }
  0x3b   : > { %s402_s8 = sshll.u32 %s816_s29, 7  ;;  %s171_s15 = scalar_lea.sflag [#allocation6], %s816_s29 }
  0x3c   : > { %s820_s19 = scalar_lea.vmem [#allocation5], %s402_s8 }
  0x3d   : > { %647 = dma.done.wait (%p908_p4), %s171_s15, 2048  }
  0x3e   : > { %649 = vsyncadd (%p908_p4), %s171_s15, 4294965248  ;;  %v683_v0 = vmov 0.0   ;;  %vm684_vm0 = vmmov 0   ;;  %v211_v1 = vld [vmem:[%s820_s19 + $0x78] sm:$0xff]  ;;  %v210_v2 = vld [vmem:[%s820_s19 + $0x70] sm:$0xff]  ;;  %s403_s18 = sshll.u32 %s816_s29, 3 }
  0x3f   : > { %425 = vmatprep.subr.mxu0 %v683_v0  ;;  %457 = vmatprep.mubr.msk.f32.mxu0 %vm684_vm0, %v683_v0  ;;  %v209_v3 = vld [vmem:[%s820_s19 + $0x68] sm:$0xff]  ;;  %v208_v4 = vld [vmem:[%s820_s19 + $0x60] sm:$0xff]  ;;  %v207_v5 = vld [vmem:[%s820_s19 + $0x58] sm:$0xff]  ;;  %s194_s20 = scalar_lea.vmem [#allocation7], %s403_s18  ;;  %s405_s26 = sshll.u32 %s668_s12, 7 }
  0x40   : > { %426 = vmatpush3.msra.mxu0 %v211_v1  ;;  %v206_v6 = vld [vmem:[%s820_s19 + $0x50] sm:$0xff]  ;;  %v205_v7 = vld [vmem:[%s820_s19 + $0x48] sm:$0xff]  ;;  %v204_v8 = vld [vmem:[%s820_s19 + $0x40] sm:$0xff]  ;;  %s299_s23 = sshll.u32 %s194_s20, 4  ;;  %s849_s30 = scalar_lea.hbm %s897_s2, %s405_s26  ;;  %s844_s23 = int_to_ptr.vmem [resolvable:$true] %s299_s23 }
  0x41   : > { %427 = vmatprep.subr.mxu0 %v683_v0  ;;  %v203_v9 = vld [vmem:[%s820_s19 + $0x38] sm:$0xff]  ;;  %v202_v10 = vld [vmem:[%s820_s19 + $0x30] sm:$0xff]  ;;  %v201_v11 = vld [vmem:[%s820_s19 + $0x28] sm:$0xff]  ;;  %s284_s25 = scalar_lea.sflag [#allocation4], %s816_s29  ;;  %s592_s3 = scalar_lea.vmem %s844_s23, 128 }
  0x42   : > { %428 = vmatpush3.msra.mxu0 %v210_v2  ;;  %v200_v12 = vld [vmem:[%s820_s19 + $0x20] sm:$0xff]  ;;  %v199_v13 = vld [vmem:[%s820_s19 + $0x18] sm:$0xff]  ;;  %v198_v14 = vld [vmem:[%s820_s19 + $0x10] sm:$0xff]  ;;  %p593_p3 = scmp.ne.s32.totalorder %s844_s23, %s592_s3  ;;  %p909_p13 = scmp.ne.s32.totalorder %s903_s21, 0 }
  0x43   : > { %429 = vmatprep.subr.mxu0 %v683_v0  ;;  %v197_v15 = vld [vmem:[%s820_s19 + $0x8] sm:$0xff]  ;;  %v196_v16 = vld [vmem:[%s820_s19] sm:$0xff]  ;;  %v195_v17 = vld [vmem:[#allocation2] sm:$0xff]  ;;  %s685_s12 = smov [#allocation7]  }
  0x44   : > { %430 = vmatpush3.msra.mxu0 %v209_v3  ;;  %p594_p5 = pnand %p593_p3, %p909_p13  ;;  %s596_s4 = sshll.u32 %s685_s12, 4  ;;  %s597_s4 = int_to_ptr.vmem [resolvable:$false] %s596_s4 }
  0x45   : > { %431 = vmatprep.subr.mxu0 %v683_v0  ;;  %s598_s6 = scalar_lea.vmem %s597_s4, 256  ;;  %p599_p12 = scmp.lt.s32.totalorder %s844_s23, %s597_s4 }
  0x46   : > { %432 = vmatpush3.msra.mxu0 %v208_v4  ;;  %p595_p1 = pneg %p594_p5  ;;  %p600_p7 = scmp.lt.s32.totalorder %s598_s6, %s592_s3 }
  0x47   : > { %433 = vmatprep.subr.mxu0 %v683_v0 }
  0x48   : > { %434 = vmatpush3.msra.mxu0 %v207_v5  ;;  %p601_p8 = por %p600_p7, %p599_p12 }
  0x49   : > { %435 = vmatprep.subr.mxu0 %v683_v0 }
  0x4a   : > { %436 = vmatpush3.msra.mxu0 %v206_v6  ;;  %p602_p9 = pnand %p601_p8, %p595_p1 }
  0x4b   : > { %437 = vmatprep.subr.mxu0 %v683_v0 }
  0x4c   : > { %438 = vmatpush3.msra.mxu0 %v205_v7 }
  0x4d   : > { %439 = vmatprep.subr.mxu0 %v683_v0 }
  0x4e   : > { %440 = vmatpush3.msra.mxu0 %v204_v8 }
  0x4f   : > { %441 = vmatprep.subr.mxu0 %v683_v0 }
  0x50   : > { %442 = vmatpush3.msra.mxu0 %v203_v9 }
  0x51   : > { %443 = vmatprep.subr.mxu0 %v683_v0 }
  0x52   : > { %444 = vmatpush3.msra.mxu0 %v202_v10 }
  0x53   : > { %445 = vmatprep.subr.mxu0 %v683_v0 }
  0x54   : > { %446 = vmatpush3.msra.mxu0 %v201_v11 }
  0x55   : > { %447 = vmatprep.subr.mxu0 %v683_v0 }
  0x56   : > { %448 = vmatpush3.msra.mxu0 %v200_v12 }
  0x57   : > { %449 = vmatprep.subr.mxu0 %v683_v0 }
  0x58   : > { %450 = vmatpush3.msra.mxu0 %v199_v13 }
  0x59   : > { %451 = vmatprep.subr.mxu0 %v683_v0 }
  0x5a   : > { %452 = vmatpush3.msra.mxu0 %v198_v14 }
  0x5b   : > { %453 = vmatprep.subr.mxu0 %v683_v0 }
  0x5c   : > { %454 = vmatpush3.msra.mxu0 %v197_v15 }
  0x5d   : > { %455 = vmatprep.subr.mxu0 %v683_v0 }
  0x5e   : > { %456 = vmatpush3.msra.mxu0 %v196_v16 }
  0x5f   : > { %458 = vmatmul.mubr.f32.vlgmr.msra.gmra.mxu0 %v195_v17 }
 0x11f   : > { %v278_v18 = vpop.f32.mrf.mxu0 }
 0x120   : > { %282 = vst [vmem:[%s194_s20] sm:$0xff] %v278_v18 }
 0x121   : > { %v459_v19 = vpop.f32.mrf.mxu0 }
 0x122   : > { %605 = shalt.err (!%p602_p9)
}
 0x123   : > { %s606_s5 = scalar_lea.hbm %s849_s30, 128  ;;  %s610_s29 = scalar_lea.hbm %s897_s2, 256 }
 0x124   : > { %p607_p0 = scmp.ne.s32.totalorder %s849_s30, %s606_s5  ;;  %p611_p10 = scmp.lt.s32.totalorder %s849_s30, %s897_s2 }
 0x125   : > { %p612_p11 = scmp.lt.s32.totalorder %s610_s29, %s606_s5 }
 0x126   : > { %p608_p2 = pnand %p607_p0, %p909_p13 }
 0x127   : > { %p613_p4 = por %p612_p11, %p611_p10 }
 0x128   : > { %p609_p6 = pneg %p608_p2 }
 0x12a   : > { %p614_p3 = pnand %p613_p4, %p609_p6 }
 0x12c   : > { %617 = shalt.err (!%p614_p3)
}
 0x12d   : > { %466 = dma.vmem_to_hbm [thread:$0]  (%p909_p13), %s844_s23, 128, %s849_s30, %s284_s25  }
 0x12e PF: > { %s311_s19 = sand.u32 1, %s656_s9   ;;  %p910_p5 = scmp.ne.s32.totalorder %s904_s22, 0 }
 0x12f   : > { %p911_p1 = scmp.ge.s32.totalorder %s676_s14, 2  ;;  %s312_s18 = scalar_lea.sflag [#allocation4], %s311_s19 }
 0x131   : > { %p477_p12 = pnand %p911_p1, %p910_p5 }
 0x133   : > { %p478_p7 = pneg %p477_p12 }
 0x135   : > { %651 = dma.done.wait (%p478_p7), %s312_s18, 128  }
 0x136   : > { %653 = vsyncadd (%p478_p7), %s312_s18, 4294967168  ;;  %s19_s14 = sadd.s32 1, %s676_s14   ;;  %s912_s9 = smov %s660_s10 }
 0x137   : > { %p16_p8 = scmp.ge.s32.totalorder %s19_s14, 4   ;;  %s913_s10 = smov %s664_s11 }
 0x138   : > { %s914_s11 = smov %s803_s27  ;;  %s915_s12 = smov %s672_s13 }
 0x139   : > { %s916_s13 = smov %s918_s28  ;;  %18 = sbr.rel (!%p16_p8) target bundleno = 7 (0x7), region = 79 }
 0x13e   :  { %317 = vsyncpa [#allocation3], 1 }
 0x13f   :  { %319 = vsyncpa [#allocation3 + $0x1], 1 }
 0x140   :  { %320 = vsyncpa [#allocation6], 1 }
 0x141   :  { %322 = vsyncpa [#allocation6 + $0x1], 1 }
 0x142   :  { %323 = vsyncpa [#allocation4], 1 }
 0x143   :  { %325 = vsyncpa [#allocation4 + $0x1], 1 }

</bundles_post_ra>
